<compile_context>
chip_gen: v7x
topology: tpu7x:2x2x1
jax: 0.10.0
libtpu: 0.0.40
codegen_flags: <defaults>
</compile_context>

<pallas_src>
import functools

import jax
import jax.numpy as jnp
import numpy as np
from jax.experimental import pallas as pl
from jax.experimental.pallas import tpu as pltpu

_LANE = 128


def _round_up(x, m):
    return ((x + m - 1) // m) * m


def _graph_embedding_kernel(a1_ref, a2_ref, x_ref, out_ref, x1_s, x2_s,
                            *, k, matmul_dtype):
    """a1_ref, a2_ref: [Np, Np] pre-normalized adjacency (already matmul_dtype).
    x_ref:   [Np, T] lane-dense tile of the [Np, B*D] feature slab.
    out_ref: [2, Np, T] block of the padded [2k+2, Np, bd_pad] output.
             Global slab layout: 0 = x, 1+2kk = A1^(kk+1) x, 2+2kk = A2^(kk+1) x,
             slab 2k+1 is padding (sliced off in the wrapper).
    x1_s, x2_s: f32 VMEM scratch carrying A1^kk x / A2^kk x across the kk axis."""
    kk = pl.program_id(1)
    precision = (jax.lax.Precision.HIGHEST
                 if jnp.dtype(matmul_dtype) == jnp.dtype(jnp.float32) else None)

    @pl.when(kk == 0)
    def _():
        x0 = x_ref[...].astype(jnp.float32)
        x1_s[...] = x0
        x2_s[...] = x0
        out_ref[0, :, :] = x0.astype(out_ref.dtype)        # global slab 0 = x

    @pl.when(kk > 0)
    def _():
        out_ref[0, :, :] = x2_s[...].astype(out_ref.dtype)  # A2^kk x (slab 2kk)

    @pl.when(kk < k)
    def _():
        x1_new = jnp.dot(a1_ref[...], x1_s[...].astype(matmul_dtype),
                         preferred_element_type=jnp.float32, precision=precision)
        x1_s[...] = x1_new
        out_ref[1, :, :] = x1_new.astype(out_ref.dtype)     # A1^(kk+1) x (slab 2kk+1)
        x2_new = jnp.dot(a2_ref[...], x2_s[...].astype(matmul_dtype),
                         preferred_element_type=jnp.float32, precision=precision)
        x2_s[...] = x2_new                                   # written next kk step

    @pl.when(kk == k)
    def _():
        # Padding slab (sliced off by the wrapper): deterministic write, no matmul.
        out_ref[1, :, :] = x1_s[...].astype(out_ref.dtype)


def graph_embedding_forward(x, edge_weight1, edge_weight2, *, n_nodes, k,
                            matmul_dtype=jnp.bfloat16):
    """x: [B, N, D] float32.  edge_weight{1,2}: [N*(N-1)//2] lower-tri values.
    Returns [1 + 2*k, B, N, D] float32, matching th.stack(x_out) of the module."""
    B, N, D = x.shape
    assert N == n_nodes

    # --- wrapper glue (tiny one-time [N,N] ops, hoisted out of the kernel) ----
    # TODO(synk): verify np.tril_indices vs th.tril_indices ordering once against
    # a ported checkpoint (same index set, row-major order — expected identical).
    xs, ys = np.tril_indices(n_nodes, k=-1)
    eye = jnp.eye(n_nodes, dtype=jnp.float32)

    def build_norm_adj(w_vec):
        w = jnp.zeros((n_nodes, n_nodes), jnp.float32).at[xs, ys].set(w_vec)
        a = w + w.T + eye
        deg = jnp.sum(a, axis=1)                 # symmetric: row deg == col deg
        inv = jnp.where(deg > 0, jax.lax.rsqrt(deg), 0.0)
        return a * inv[:, None] * inv[None, :]   # D^{-1/2} A D^{-1/2}

    a1 = build_norm_adj(edge_weight1)
    a2 = build_norm_adj(edge_weight2)

    # Pad N to a sublane multiple (unmasked sublane stores, esp. on v5e).
    n_pad = _round_up(N, 8)
    if n_pad != N:
        a1 = jnp.pad(a1, ((0, n_pad - N), (0, n_pad - N)))
        a2 = jnp.pad(a2, ((0, n_pad - N), (0, n_pad - N)))
    a1 = a1.astype(matmul_dtype)
    a2 = a2.astype(matmul_dtype)

    # --- layout plumbing: [B, N, D] -> lane-dense [n_pad, B*D] slab ------------
    bd = B * D
    x2d = jnp.transpose(x, (1, 0, 2)).reshape(N, bd)
    if n_pad != N:
        x2d = jnp.pad(x2d, ((0, n_pad - N), (0, 0)))

    # --- lane-tile selection + VMEM budget -------------------------------------
    a_itemsize = jnp.dtype(matmul_dtype).itemsize

    def vmem_need(t):
        a_b = 2 * 2 * n_pad * n_pad * a_itemsize        # A1, A2 (double-buffered)
        x_b = 2 * n_pad * t * 4                          # x tile
        out_b = 2 * 2 * n_pad * t * 4                    # [2, Np, t] out block
        scr_b = 2 * n_pad * t * 4                        # x1_s, x2_s
        return a_b + x_b + out_b + scr_b

    bd128 = _round_up(bd, _LANE)
    tile = min(1024, bd128)
    if bd128 >= 2 * _LANE:
        # >= 2 lane-tile grid steps so both v7x TensorCores get work ("parallel").
        tile = min(tile, _round_up(bd128 // 2, _LANE))
    VMEM_BUDGET = 48 * 1024 * 1024                       # headroom under v7x 64 MiB
    while tile > _LANE and vmem_need(tile) > VMEM_BUDGET:
        tile = _round_up(tile // 2, _LANE)

    bd_pad = _round_up(bd, tile)
    if bd_pad != bd:
        x2d = jnp.pad(x2d, ((0, 0), (0, bd_pad - bd)))
    grid = (bd_pad // tile, k + 1)

    vmem_limit = min(128 * 1024 * 1024,
                     max(16 * 1024 * 1024, 2 * vmem_need(tile) + (4 << 20)))

    # NOTE: out dtype kept f32 to match the module; bf16 output is the single
    # biggest HBM lever on v5e if downstream tolerates it.
    kernel = functools.partial(_graph_embedding_kernel, k=k,
                               matmul_dtype=matmul_dtype)
    out2d = pl.pallas_call(
        kernel,
        out_shape=jax.ShapeDtypeStruct((2 * k + 2, n_pad, bd_pad), jnp.float32),
        grid_spec=pltpu.PrefetchScalarGridSpec(
            num_scalar_prefetch=0,
            grid=grid,
            in_specs=[
                pl.BlockSpec((n_pad, n_pad), lambda j, kk: (0, 0)),   # A1
                pl.BlockSpec((n_pad, n_pad), lambda j, kk: (0, 0)),   # A2
                pl.BlockSpec((n_pad, tile), lambda j, kk: (0, j)),    # x tile
            ],
            out_specs=pl.BlockSpec((2, n_pad, tile), lambda j, kk: (kk, 0, j)),
            scratch_shapes=[pltpu.VMEM((n_pad, tile), jnp.float32),   # x1 carry
                            pltpu.VMEM((n_pad, tile), jnp.float32)],  # x2 carry
        ),
        compiler_params=pltpu.CompilerParams(
            dimension_semantics=("parallel", "arbitrary"),
            vmem_limit_bytes=vmem_limit,
        ),
    )(a1, a2, x2d)

    # --- back to the module's [1 + 2k, B, N, D] layout (no concat needed) ------
    out = out2d[:2 * k + 1, :N, :bd].reshape(2 * k + 1, N, B, D)
    return out.transpose(0, 2, 1, 3)


def _reference_forward(x, edge_weight1, edge_weight2, *, n_nodes, k):
    """Pure-JAX reference mirroring the PyTorch module (explicit A^k chain)."""
    xs, ys = np.tril_indices(n_nodes, k=-1)
    w1 = jnp.zeros((n_nodes, n_nodes), jnp.float32).at[xs, ys].set(edge_weight1)
    w2 = jnp.zeros((n_nodes, n_nodes), jnp.float32).at[xs, ys].set(edge_weight2)
    eye = jnp.eye(n_nodes, dtype=jnp.float32)
    a1 = w1 + w1.T + eye
    a2 = w2 + w2.T + eye

    def norm(a):
        d = jnp.sum(a, axis=1)
        dis = jnp.where(d > 0, 1.0 / jnp.sqrt(d), 0.0)
        return a * dis[:, None] * dis[None, :]

    a1 = norm(a1)
    a2 = norm(a2)
    outs = [x]
    a1i, a2i = a1, a2
    hp = jax.lax.Precision.HIGHEST
    for _ in range(k):
        outs.append(jnp.einsum("ij,bjd->bid", a1i, x, precision=hp))
        outs.append(jnp.einsum("ij,bjd->bid", a2i, x, precision=hp))
        a1i = jnp.dot(a1i, a1, precision=hp)
        a2i = jnp.dot(a2i, a2, precision=hp)
    return jnp.stack(outs)


if __name__ == "__main__":
    n_nodes = 16
    input_dim = 32
    batch = 4          # B * D = 128 -> exactly one lane-dense tile
    k = 2

    key = jax.random.PRNGKey(0)
    k_adj1, k_adj2, k_x = jax.random.split(key, 3)

    # Deterministic synthetic "adjacency" matrices (non-negative weights).
    adj1 = jax.random.uniform(k_adj1, (n_nodes, n_nodes), jnp.float32)
    adj2 = jax.random.uniform(k_adj2, (n_nodes, n_nodes), jnp.float32)
    adj1 = 0.5 * (adj1 + adj1.T)
    adj2 = 0.5 * (adj2 + adj2.T)

    # Parameter init exactly as in __init__: lower-triangular (offset=-1) entries.
    xs, ys = np.tril_indices(n_nodes, k=-1)
    edge_weight1 = adj1[xs, ys]
    edge_weight2 = adj2[xs, ys]

    x = jax.random.normal(k_x, (batch, n_nodes, input_dim), jnp.float32)

    ref = _reference_forward(x, edge_weight1, edge_weight2,
                             n_nodes=n_nodes, k=k)

    # f32-operand path: faithful to the module's f32 semantics (tight check).
    out_f32 = graph_embedding_forward(x, edge_weight1, edge_weight2,
                                      n_nodes=n_nodes, k=k,
                                      matmul_dtype=jnp.float32)
    out_f32 = jax.block_until_ready(out_f32)
    assert out_f32.shape == (1 + 2 * k, batch, n_nodes, input_dim), out_f32.shape
    np.testing.assert_allclose(np.asarray(out_f32), np.asarray(ref),
                               rtol=1e-4, atol=1e-5)

    # bf16-operand MXU path (performance default): looser tolerance since the
    # recursive bf16 propagation compounds rounding k times vs the f32 chain.
    out_bf16 = graph_embedding_forward(x, edge_weight1, edge_weight2,
                                       n_nodes=n_nodes, k=k,
                                       matmul_dtype=jnp.bfloat16)
    out_bf16 = jax.block_until_ready(out_bf16)
    assert out_bf16.shape == (1 + 2 * k, batch, n_nodes, input_dim), out_bf16.shape
    np.testing.assert_allclose(np.asarray(out_bf16), np.asarray(ref),
                               rtol=5e-2, atol=5e-2)

    print("KERNEL_OK")
</pallas_src>

<mosaic_0001>
module attributes {stable_mosaic.version = 11 : i64} {
  func.func @_graph_embedding_kernel(%arg0: i32, %arg1: i32, %arg2: memref<16x16xf32, #tpu.memory_space<vmem>>, %arg3: memref<16x16xf32, #tpu.memory_space<vmem>>, %arg4: memref<16x128xf32, #tpu.memory_space<vmem>>, %arg5: memref<2x16x128xf32, #tpu.memory_space<vmem>>, %arg6: memref<16x128xf32, #tpu.memory_space<vmem>>, %arg7: memref<16x128xf32, #tpu.memory_space<vmem>>) attributes {dimension_semantics = [#tpu.dimension_semantics<parallel>, #tpu.dimension_semantics<arbitrary>], iteration_bounds = array<i64: 1, 3>, scalar_prefetch = 0 : i64, scratch_operands = 2 : i64, tpu.core_type = #tpu.core_type<tc>, window_params = [{pipeline_mode = #tpu.pipeline_mode<synchronous>, transform_indices = @transform_0, window_bounds = array<i64: 16, 16>}, {pipeline_mode = #tpu.pipeline_mode<synchronous>, transform_indices = @transform_1, window_bounds = array<i64: 16, 16>}, {transform_indices = @transform_2, window_bounds = array<i64: 16, 128>}, {transform_indices = @transform_3, window_bounds = array<i64: 2, 16, 128>}]} {
    %c0_i32 = arith.constant 0 : i32
    %0 = arith.cmpi eq, %arg1, %c0_i32 : i32
    %1 = arith.extui %0 : i1 to i32
    %c0_i32_0 = arith.constant 0 : i32
    %2 = arith.cmpi ne, %1, %c0_i32_0 : i32
    scf.if %2 {
      %c0 = arith.constant 0 : index
      %c0_6 = arith.constant 0 : index
      %12 = vector.load %arg4[%c0, %c0_6] : memref<16x128xf32, #tpu.memory_space<vmem>>, vector<16x128xf32>
      %c0_7 = arith.constant 0 : index
      %c0_8 = arith.constant 0 : index
      %13 = vector.load %arg6[%c0_7, %c0_8] : memref<16x128xf32, #tpu.memory_space<vmem>>, vector<16x128xf32>
      tpu.vector_store %arg6[%c0_7, %c0_8], %12 {strides = array<i32>} : memref<16x128xf32, #tpu.memory_space<vmem>>, vector<16x128xf32>,
      %c0_9 = arith.constant 0 : index
      %c0_10 = arith.constant 0 : index
      %14 = vector.load %arg7[%c0_9, %c0_10] : memref<16x128xf32, #tpu.memory_space<vmem>>, vector<16x128xf32>
      tpu.vector_store %arg7[%c0_9, %c0_10], %12 {strides = array<i32>} : memref<16x128xf32, #tpu.memory_space<vmem>>, vector<16x128xf32>,
      %c0_11 = arith.constant 0 : index
      %c0_12 = arith.constant 0 : index
      %c0_13 = arith.constant 0 : index
      %15 = vector.load %arg5[%c0_11, %c0_12, %c0_13] : memref<2x16x128xf32, #tpu.memory_space<vmem>>, vector<1x16x128xf32>
      %16 = vector.shape_cast %15 : vector<1x16x128xf32> to vector<16x128xf32>
      %17 = vector.shape_cast %12 : vector<16x128xf32> to vector<1x16x128xf32>
      tpu.vector_store %arg5[%c0_11, %c0_12, %c0_13], %17 {strides = array<i32>} : memref<2x16x128xf32, #tpu.memory_space<vmem>>, vector<1x16x128xf32>,
    } else {
    }
    %c0_i32_1 = arith.constant 0 : i32
    %3 = arith.cmpi sgt, %arg1, %c0_i32_1 : i32
    %4 = arith.extui %3 : i1 to i32
    %c0_i32_2 = arith.constant 0 : i32
    %5 = arith.cmpi ne, %4, %c0_i32_2 : i32
    scf.if %5 {
      %c0 = arith.constant 0 : index
      %c0_6 = arith.constant 0 : index
      %12 = vector.load %arg7[%c0, %c0_6] : memref<16x128xf32, #tpu.memory_space<vmem>>, vector<16x128xf32>
      %c0_7 = arith.constant 0 : index
      %c0_8 = arith.constant 0 : index
      %c0_9 = arith.constant 0 : index
      %13 = vector.load %arg5[%c0_7, %c0_8, %c0_9] : memref<2x16x128xf32, #tpu.memory_space<vmem>>, vector<1x16x128xf32>
      %14 = vector.shape_cast %13 : vector<1x16x128xf32> to vector<16x128xf32>
      %15 = vector.shape_cast %12 : vector<16x128xf32> to vector<1x16x128xf32>
      tpu.vector_store %arg5[%c0_7, %c0_8, %c0_9], %15 {strides = array<i32>} : memref<2x16x128xf32, #tpu.memory_space<vmem>>, vector<1x16x128xf32>,
    } else {
    }
    %c2_i32 = arith.constant 2 : i32
    %6 = arith.cmpi slt, %arg1, %c2_i32 : i32
    %7 = arith.extui %6 : i1 to i32
    %c0_i32_3 = arith.constant 0 : i32
    %8 = arith.cmpi ne, %7, %c0_i32_3 : i32
    scf.if %8 {
      %c0 = arith.constant 0 : index
      %c0_6 = arith.constant 0 : index
      %12 = vector.load %arg2[%c0, %c0_6] : memref<16x16xf32, #tpu.memory_space<vmem>>, vector<16x16xf32>
      %c0_7 = arith.constant 0 : index
      %c0_8 = arith.constant 0 : index
      %13 = vector.load %arg6[%c0_7, %c0_8] : memref<16x128xf32, #tpu.memory_space<vmem>>, vector<16x128xf32>
      %cst = arith.constant dense<0.000000e+00> : vector<16x128xf32>
      %14 = tpu.matmul %12, %13, %cst {dimension_numbers = #tpu.dot_dimension_numbers<[1], [0], [0], [1], [0, 0, 1, 1], [], []>, precision = #tpu.contract_precision<fp32>} : vector<16x16xf32>, vector<16x128xf32>, vector<16x128xf32> -> vector<16x128xf32>
      %c0_9 = arith.constant 0 : index
      %c0_10 = arith.constant 0 : index
      %15 = vector.load %arg6[%c0_9, %c0_10] : memref<16x128xf32, #tpu.memory_space<vmem>>, vector<16x128xf32>
      tpu.vector_store %arg6[%c0_9, %c0_10], %14 {strides = array<i32>} : memref<16x128xf32, #tpu.memory_space<vmem>>, vector<16x128xf32>,
      %c1 = arith.constant 1 : index
      %c0_11 = arith.constant 0 : index
      %c0_12 = arith.constant 0 : index
      %16 = vector.load %arg5[%c1, %c0_11, %c0_12] : memref<2x16x128xf32, #tpu.memory_space<vmem>>, vector<1x16x128xf32>
      %17 = vector.shape_cast %16 : vector<1x16x128xf32> to vector<16x128xf32>
      %18 = vector.shape_cast %14 : vector<16x128xf32> to vector<1x16x128xf32>
      tpu.vector_store %arg5[%c1, %c0_11, %c0_12], %18 {strides = array<i32>} : memref<2x16x128xf32, #tpu.memory_space<vmem>>, vector<1x16x128xf32>,
      %c0_13 = arith.constant 0 : index
      %c0_14 = arith.constant 0 : index
      %19 = vector.load %arg3[%c0_13, %c0_14] : memref<16x16xf32, #tpu.memory_space<vmem>>, vector<16x16xf32>
      %c0_15 = arith.constant 0 : index
      %c0_16 = arith.constant 0 : index
      %20 = vector.load %arg7[%c0_15, %c0_16] : memref<16x128xf32, #tpu.memory_space<vmem>>, vector<16x128xf32>
      %cst_17 = arith.constant dense<0.000000e+00> : vector<16x128xf32>
      %21 = tpu.matmul %19, %20, %cst_17 {dimension_numbers = #tpu.dot_dimension_numbers<[1], [0], [0], [1], [0, 0, 1, 1], [], []>, precision = #tpu.contract_precision<fp32>} : vector<16x16xf32>, vector<16x128xf32>, vector<16x128xf32> -> vector<16x128xf32>
      %c0_18 = arith.constant 0 : index
      %c0_19 = arith.constant 0 : index
      %22 = vector.load %arg7[%c0_18, %c0_19] : memref<16x128xf32, #tpu.memory_space<vmem>>, vector<16x128xf32>
      tpu.vector_store %arg7[%c0_18, %c0_19], %21 {strides = array<i32>} : memref<16x128xf32, #tpu.memory_space<vmem>>, vector<16x128xf32>,
    } else {
    }
    %c2_i32_4 = arith.constant 2 : i32
    %9 = arith.cmpi eq, %arg1, %c2_i32_4 : i32
    %10 = arith.extui %9 : i1 to i32
    %c0_i32_5 = arith.constant 0 : i32
    %11 = arith.cmpi ne, %10, %c0_i32_5 : i32
    scf.if %11 {
      %c0 = arith.constant 0 : index
      %c0_6 = arith.constant 0 : index
      %12 = vector.load %arg6[%c0, %c0_6] : memref<16x128xf32, #tpu.memory_space<vmem>>, vector<16x128xf32>
      %c1 = arith.constant 1 : index
      %c0_7 = arith.constant 0 : index
      %c0_8 = arith.constant 0 : index
      %13 = vector.load %arg5[%c1, %c0_7, %c0_8] : memref<2x16x128xf32, #tpu.memory_space<vmem>>, vector<1x16x128xf32>
      %14 = vector.shape_cast %13 : vector<1x16x128xf32> to vector<16x128xf32>
      %15 = vector.shape_cast %12 : vector<16x128xf32> to vector<1x16x128xf32>
      tpu.vector_store %arg5[%c1, %c0_7, %c0_8], %15 {strides = array<i32>} : memref<2x16x128xf32, #tpu.memory_space<vmem>>, vector<1x16x128xf32>,
    } else {
    }
    return
  }
  func.func @transform_0(%arg0: i32, %arg1: i32) -> (i32, i32) {
    %c0_i32 = arith.constant 0 : i32
    %c0_i32_0 = arith.constant 0 : i32
    %c0_i32_1 = arith.constant 0 : i32
    return %c0_i32, %c0_i32_0 : i32, i32
  }
  func.func @transform_1(%arg0: i32, %arg1: i32) -> (i32, i32) {
    %c0_i32 = arith.constant 0 : i32
    %c0_i32_0 = arith.constant 0 : i32
    %c0_i32_1 = arith.constant 0 : i32
    return %c0_i32, %c0_i32_0 : i32, i32
  }
  func.func @transform_2(%arg0: i32, %arg1: i32) -> (i32, i32) {
    %c0_i32 = arith.constant 0 : i32
    %c0_i32_0 = arith.constant 0 : i32
    return %c0_i32, %arg0 : i32, i32
  }
  func.func @transform_3(%arg0: i32, %arg1: i32) -> (i32, i32, i32) {
    %c0_i32 = arith.constant 0 : i32
    %c0_i32_0 = arith.constant 0 : i32
    return %arg1, %c0_i32, %arg0 : i32, i32, i32
  }
}

</mosaic_0001>

<bundles_post_ra>
// kernel: tpu_custom_call.1
= control target key start
LH: loop header
LB: loop body
LE: loop exit
PB: predicated region body
PF: predicated region fallthrough
CT: control target
= control target key end

     0   :  { %s2194_s0 = inlined_call_operand.hbm [shape: f32[16,16], index: 0, kind: input, shape index: {}]   ;;  %s2195_s1 = inlined_call_operand.hbm [shape: f32[16,16], index: 1, kind: input, shape index: {}]   ;;  %s2196_s2 = inlined_call_operand.hbm [shape: f32[16,128], index: 2, kind: input, shape index: {}]   ;;  %s2197_s3 = inlined_call_operand.hbm [shape: f32[6,16,128], index: 3, kind: output, shape index: {}]  }
   0x1   :  { %2202 = sst [smem:[#allocation14_spill]] %s2195_s1 }
   0x2   :  { %8 = vsyncpa [#allocation5], 0 }
   0x3   :  { %9 = vsyncpa [#allocation8], 0 }
   0x4   :  { %10 = vsyncpa [#allocation6], 0 }
   0x5   :  { %12 = vsyncpa [#allocation6 + $0x1], 0  ;;  %s1906_s12 = smov 0   ;;  %s1908_s13 = smov 0  }
   0x6   :  { %s1910_s14 = smov 0   ;;  %s1912_s15 = smov 0  }
   0x7   :  { %s1914_s16 = smov 0   ;;  %s1916_s17 = smov 0  }
   0x8 LB: > { %s1389_s18 = sadd.s32 4294967295, %s1876_s17   ;;  %s1390_s19 = sadd.s32 4294967294, %s1876_s17   ;;  %s1876_s17 = sphi %s1916_s17, %s18_s17   ;;  %s1872_s16 = sphi %s1914_s16, %s2218_s16   ;;  %s1868_s15 = sphi %s1912_s15, %s2217_s15   ;;  %s1864_s14 = sphi %s1910_s14, %s2216_s14   ;;  %s1860_s13 = sphi %s1908_s13, %s2215_s13   ;;  %s1856_s12 = sphi %s1906_s12, %s2214_s12  }
   0x9   : > { %s27_s20 = sadd.s32 1, %s1872_s16  ;;  %s107_s21 = sadd.s32 1, %s1864_s14 }
   0xa   : > { %p28_p0 = scmp.ge.s32.totalorder %s27_s20, 3  ;;  %p117_p1 = scmp.ne.s32.totalorder %s1864_s14, %s1860_s13 }
   0xb   : > { %p118_p2 = scmp.eq.s32.totalorder %s1389_s18, 2  ;;  %p123_p3 = scmp.ne.s32.totalorder %s1860_s13, %s1856_s12 }
   0xc   : > { %s2220_s20 = smov (%p28_p0, %s27_s20), 0  ;;  %p124_p5 = scmp.eq.s32.totalorder %s1390_s19, 2 }
   0xd   : > { %p1946_p4 = por %p118_p2, %p117_p1  ;;  %s102_s23 = ssub.s32 %s1872_s16, %s2220_s20 }
   0xe   : > { %p1391_p6 = scmp.ge.s32.totalorder %s1876_s17, 1  ;;  %p105_p7 = scmp.eq.s32.totalorder %s102_s23, 0 }
   0xf   : > { %s2203_s22 = scalar_select %p1946_p4, 1, 0 }
  0x10   : > { %p1953_p8 = por %p124_p5, %p123_p3  ;;  %p131_p9 = scmp.lt.s32.totalorder %s1876_s17, 4 }
  0x11   : > { %s1959_s25 = scalar_select %p105_p7, %s1864_s14, %s107_s21  }
  0x12   : > { %s2204_s24 = scalar_select %p1953_p8, 1, 0 }
  0x13   : > { %p1961_p10 = pnand %p1391_p6, %p131_p9  ;;  %p1965_p11 = scmp.eq.s32.totalorder %s1389_s18, 0 }
  0x14   : > { %s1878_s28 = smov [#allocation7]   ;;  %s1879_s4 = smov [#allocation4]  }
  0x15   : > { %s2205_s26 = scalar_select %p1961_p10, 1, 0 }
  0x16   : > { %s2206_s27 = scalar_select %p1965_p11, 1, 0 }
  0x17   : > { %p1630_p12 = pneg %p1961_p10  ;;  %s156_s29 = sshll.u32 %s1878_s28, 4  ;;  %s157_s29 = int_to_ptr.vmem [resolvable:$true] %s156_s29 }
  0x18   : > { %s143_s5 = sshll.u32 %s1879_s4, 4  ;;  %s2208_s1 = sld [smem:[#allocation14_spill]]  ;;  %s144_s5 = int_to_ptr.vmem [resolvable:$true] %s143_s5 }
  0x19   : > { %p1973_p13 = pnand %p1965_p11, %p1630_p12 }
  0x1b   : > { %p1985_p1 = pneg %p1973_p13 }
  0x1e   : > { %s1706_s8 = scalar_lea.hbm %s2208_s1, 256 }
  0x1f   : > { %p1707_p0 = scmp.ne.s32.totalorder %s2208_s1, %s1706_s8  ;;  %p1713_p5 = scmp.lt.u32.totalorder %s1706_s8, %s2208_s1 }
  0x21   : > { %p1709_p2 = pnand %p1985_p1, %p1707_p0 }
  0x23   : > { %p1710_p3 = pneg %p1709_p2 }
  0x25   : > { %p1715_p6 = pnand %p1713_p5, %p1710_p3 }
  0x27   : > { %1718 = shalt.err (!%p1715_p6)
}
  0x28   : > { %s1719_s21 = scalar_lea.vmem %s157_s29, 256  ;;  %p1727_p8 = scmp.lt.s32.totalorder %s157_s29, %s157_s29 }
  0x29   : > { %p1720_p7 = scmp.ne.s32.totalorder %s157_s29, %s1719_s21  ;;  %p1728_p4 = scmp.lt.s32.totalorder %s1719_s21, %s1719_s21 }
  0x2b   : > { %p1722_p9 = pnand %p1720_p7, %p1985_p1  ;;  %p1729_p11 = por %p1728_p4, %p1727_p8 }
  0x2d   : > { %p1723_p12 = pneg %p1722_p9 }
  0x2f   : > { %p1730_p10 = pnand %p1729_p11, %p1723_p12 }
  0x31   : > { %1733 = shalt.err (!%p1730_p10)
}
  0x32   : > { %s1880_s23 = smov 128   ;;  %s1881_s28 = smov 8  }
  0x33   : > { %1636 = dma.hbm_to_vmem [thread:$0]  (!%p1973_p13), %s2208_s1, 256, %s157_s29, [#allocation8], %s1880_s23, %s1880_s23, %s1881_s28  }
  0x34   : > { %s1734_s9 = scalar_lea.hbm %s2194_s0, 256 }
  0x35   : > { %p1735_p4 = scmp.ne.s32.totalorder %s2194_s0, %s1734_s9  ;;  %p1741_p11 = scmp.lt.u32.totalorder %s1734_s9, %s2194_s0 }
  0x37   : > { %p1737_p8 = pnand %p1735_p4, %p1985_p1 }
  0x39   : > { %p1738_p10 = pneg %p1737_p8 }
  0x3b   : > { %p1743_p0 = pnand %p1741_p11, %p1738_p10 }
  0x3d   : > { %1746 = shalt.err (!%p1743_p0)
}
  0x3e   : > { %s1747_s4 = scalar_lea.vmem %s144_s5, 256  ;;  %p1755_p6 = scmp.lt.s32.totalorder %s144_s5, %s144_s5 }
  0x3f   : > { %p1748_p2 = scmp.ne.s32.totalorder %s144_s5, %s1747_s4  ;;  %p1756_p7 = scmp.lt.s32.totalorder %s1747_s4, %s1747_s4 }
  0x41   : > { %p1750_p3 = pnand %p1748_p2, %p1985_p1  ;;  %p1757_p9 = por %p1756_p7, %p1755_p6 }
  0x43   : > { %p1751_p5 = pneg %p1750_p3 }
  0x45   : > { %p1758_p12 = pnand %p1757_p9, %p1751_p5 }
  0x47   : > { %1761 = shalt.err (!%p1758_p12)
}
  0x48   : > { %1633 = dma.hbm_to_vmem [thread:$0]  (!%p1973_p13), %s2194_s0, 256, %s144_s5, [#allocation5], %s1880_s23, %s1880_s23, %s1881_s28  }
  0x49   : > { %s1882_s7 = smov [#allocation9]   ;;  %s1762_s18 = scalar_lea.hbm %s2196_s2, 256 }
  0x4a   : > { %s171_s8 = sshll.u32 %s1882_s7, 4  ;;  %p1763_p4 = scmp.ne.s32.totalorder %s2196_s2, %s1762_s18  ;;  %s172_s8 = int_to_ptr.vmem [resolvable:$true] %s171_s8 }
  0x4b   : > { %p1769_p11 = scmp.lt.u32.totalorder %s1762_s18, %s2196_s2 }
  0x4c   : > { %p1765_p8 = pnand %p1763_p4, %p1985_p1 }
  0x4e   : > { %p1766_p10 = pneg %p1765_p8 }
  0x50   : > { %p1771_p0 = pnand %p1769_p11, %p1766_p10 }
  0x52   : > { %1774 = shalt.err (!%p1771_p0)
}
  0x53   : > { %s1775_s5 = scalar_lea.vmem %s172_s8, 256  ;;  %p1783_p6 = scmp.lt.s32.totalorder %s172_s8, %s172_s8 }
  0x54   : > { %p1776_p2 = scmp.ne.s32.totalorder %s172_s8, %s1775_s5  ;;  %p1784_p7 = scmp.lt.s32.totalorder %s1775_s5, %s1775_s5 }
  0x56   : > { %p1778_p3 = pnand %p1776_p2, %p1985_p1  ;;  %p1785_p9 = por %p1784_p7, %p1783_p6 }
  0x58   : > { %p1779_p5 = pneg %p1778_p3 }
  0x5a   : > { %p1786_p12 = pnand %p1785_p9, %p1779_p5 }
  0x5c   : > { %1789 = shalt.err (!%p1786_p12)
}
  0x5d   : > { %1639 = dma.hbm_to_vmem [thread:$0]  (!%p1973_p13), %s2196_s2, 256, %s172_s8, [#allocation8], %s1880_s23, %s1880_s23, %s1881_s28  }
  0x5e   : > { %p2210_p4 = scmp.ne.s32.totalorder %s2205_s26, 0 }
  0x5f   : > { %p2211_p1 = scmp.ne.s32.totalorder (!%p2210_p4), %s2206_s27, 0 }
  0x60   : > { %187 = sbr.rel (%p2210_p4) target bundleno = 430 (0x1ae), region = 32 }
  0x67   : > { %1843 = dma.done.wait (%p2211_p1), [#allocation5], 256  }
  0x68   : > { %1845 = vsyncadd (%p2211_p1), [#allocation5], 4294967040 }
  0x69   : > { %1847 = dma.done.wait (%p2211_p1), [#allocation8], 512  }
  0x6a   : > { %1849 = vsyncadd (%p2211_p1), [#allocation8], 4294966784  ;;  %s211_s30 = sand.u32 1, %s1860_s13   ;;  %p1400_p13 = scmp.ne.s32.totalorder %s1868_s15, 0 }
  0x6b   : > { %s1399_s11 = sshll.u32 %s211_s30, 5  ;;  %v219_v0 = vld [vmem:[#allocation9] sm:$0xff] (!%p1400_p13)  ;;  %v220_v1 = vld [vmem:[#allocation9 + $0x8] sm:$0xff] (!%p1400_p13) }
  0x6c   : > { %s2059_s23 = scalar_lea.vmem [#allocation10], %s1399_s11  ;;  %218 = sbr.rel (%p1400_p13) target bundleno = 115 (0x73), region = 48  ;;  %221 = vst [vmem:[#allocation2] sm:$0xff] (!%p1400_p13), %v219_v0  ;;  %223 = vst [vmem:[#allocation3] sm:$0xff] (!%p1400_p13), %v219_v0 }
  0x6d   : > { %225 = vst [vmem:[%s2059_s23] sm:$0xff] (!%p1400_p13), %v219_v0  ;;  %222 = vst [vmem:[#allocation2 + $0x8] sm:$0xff] (!%p1400_p13), %v220_v1 }
  0x6e   : > { %224 = vst [vmem:[#allocation3 + $0x8] sm:$0xff] (!%p1400_p13), %v220_v1  ;;  %226 = vst [vmem:[%s2059_s23 + $0x8] sm:$0xff] (!%p1400_p13), %v220_v1 }
  0x73 PF: > { %p1401_p8 = scmp.le.s32.totalorder %s1868_s15, 0 }
  0x74   : > { %v231_v2 = vld [vmem:[#allocation3] sm:$0xff] (!%p1401_p8) }
  0x75   : > { %230 = sbr.rel (%p1401_p8) target bundleno = 124 (0x7c), region = 52  ;;  %v232_v3 = vld [vmem:[#allocation3 + $0x8] sm:$0xff] (!%p1401_p8)  ;;  %233 = vst [vmem:[%s2059_s23] sm:$0xff] (!%p1401_p8), %v231_v2 }
  0x76   : > { %234 = vst [vmem:[%s2059_s23 + $0x8] sm:$0xff] (!%p1401_p8), %v232_v3 }
  0x7c PF: > { %p1402_p10 = scmp.ge.s32.totalorder %s1868_s15, 2 }
  0x7d   : > { %v241_v4 = vld [vmem:[#allocation2] sm:$0xff] (!%p1402_p10)  ;;  %v242_v5 = vld [vmem:[#allocation2 + $0x8] sm:$0xff] (!%p1402_p10)  ;;  %v759_v6 = vld [vmem:[#allocation3] sm:$0xff] (!%p1402_p10)  ;;  %vm243_vm0 = vcmask (!%p1402_p10), 130048  }
  0x7e   : > { %238 = sbr.rel (%p1402_p10) target bundleno = 395 (0x18b), region = 56  ;;  %v251_v7 = vand.u32 (!%p1402_p10), 4294901760, %v241_v4  ;;  %v254_v8 = vand.u32 (!%p1402_p10), 4294901760, %v242_v5  ;;  %v760_v9 = vld [vmem:[#allocation3 + $0x8] sm:$0xff] (!%p1402_p10)  ;;  %v768_v10 = vand.u32 (!%p1402_p10), 4294901760, %v759_v6  ;;  %v239_v11 = vld [vmem:[#allocation4] sm:$0xff] (!%p1402_p10) }
  0x7f   : > { %v757_v12 = vld [vmem:[#allocation7] sm:$0xff] (!%p1402_p10)  ;;  %v771_v13 = vand.u32 (!%p1402_p10), 4294901760, %v760_v9  ;;  %v245_v14 = vsel (!%p1402_p10), %vm243_vm0, %v239_v11, 0  ;;  %v240_v16 = vld [vmem:[#allocation4 + $0x8] sm:$0xff] (!%p1402_p10)  ;;  %v758_v17 = vld [vmem:[#allocation7 + $0x8] sm:$0xff] (!%p1402_p10) }
  0x80   : > { %v762_v15 = vsel (!%p1402_p10), %vm243_vm0, %v757_v12, 0  ;;  %v2070_v18 = vpack.c.bf16 (!%p1402_p10), %v254_v8, %v251_v7  ;;  %v2072_v19 = vand.u32 (!%p1402_p10), 4294901760, %v245_v14  ;;  %v248_v21 = vsel (!%p1402_p10), %vm243_vm0, %v240_v16, 0 }
  0x81   : > { %v2074_v20 = vand.u32 (!%p1402_p10), 4294901760, %v762_v15  ;;  %v2077_v22 = vpack.c.bf16 (!%p1402_p10), %v771_v13, %v768_v10  ;;  %v2079_v23 = vand.u32 (!%p1402_p10), 4294901760, %v248_v21  ;;  %v2081_v24 = vsub.f32 (!%p1402_p10), %v241_v4, %v251_v7 }
  0x82   : > { %v346_v25 = vsub.f32 (!%p1402_p10), %v242_v5, %v254_v8  ;;  %1549 = vmatprep.subr.bf16.mxu0 (!%p1402_p10), %v2070_v18  ;;  %v2085_v26 = vsub.f32 (!%p1402_p10), %v245_v14, %v2072_v19  ;;  %v765_v28 = vsel (!%p1402_p10), %vm243_vm0, %v758_v17, 0  ;;  %v856_v29 = vsub.f32 (!%p1402_p10), %v759_v6, %v768_v10 }
  0x83   : > { %v2088_v27 = vsub.f32 (!%p1402_p10), %v762_v15, %v2074_v20  ;;  %1573 = vmatprep.subr.bf16.mxu1 (!%p1402_p10), %v2077_v22  ;;  %1551 = vmatpush3.bf16.msra.mxu0 (!%p1402_p10), %v2070_v18  ;;  %v2094_v30 = vsub.f32 (!%p1402_p10), %v248_v21, %v2079_v23  ;;  %v340_v31 = vand.u32 (!%p1402_p10), 4294901760, %v2081_v24  ;;  %v2097_v33 = vand.u32 (!%p1402_p10), 4294901760, %v765_v28 }
  0x84   : > { %v347_v32 = vand.u32 (!%p1402_p10), 4294901760, %v346_v25  ;;  %1575 = vmatpush3.bf16.msra.mxu1 (!%p1402_p10), %v2077_v22  ;;  %v319_v34 = vand.u32 (!%p1402_p10), 4294901760, %v2085_v26  ;;  %v857_v36 = vand.u32 (!%p1402_p10), 4294901760, %v856_v29  ;;  %v863_v37 = vsub.f32 (!%p1402_p10), %v760_v9, %v771_v13 }
  0x85   : > { %v836_v35 = vand.u32 4294901760, %v2088_v27  ;;  %v329_v38 = vand.u32 4294901760, %v2094_v30  ;;  %v341_v39 = vsub.f32 %v2081_v24, %v340_v31  ;;  %v845_v41 = vsub.f32 %v765_v28, %v2097_v33 }
  0x86   : > { %v348_v40 = vsub.f32 %v346_v25, %v347_v32  ;;  %v320_v42 = vsub.f32 %v2085_v26, %v319_v34  ;;  %v858_v44 = vsub.f32 %v856_v29, %v857_v36  ;;  %v864_v45 = vand.u32 4294901760, %v863_v37 }
  0x87   : > { %v837_v43 = vsub.f32 %v2088_v27, %v836_v35  ;;  %v330_v46 = vsub.f32 %v2094_v30, %v329_v38  ;;  %v342_v47 = vand.u32 4294901760, %v341_v39  ;;  %v846_v49 = vand.u32 4294901760, %v845_v41 }
  0x88   : > { %v349_v48 = vand.u32 4294901760, %v348_v40  ;;  %v321_v50 = vand.u32 4294901760, %v320_v42  ;;  %v859_v52 = vand.u32 4294901760, %v858_v44  ;;  %v865_v53 = vsub.f32 %v863_v37, %v864_v45 }
  0x89   : > { %v838_v51 = vand.u32 4294901760, %v837_v43  ;;  %v331_v54 = vand.u32 4294901760, %v330_v46  ;;  %v847_v56 = vsub.f32 %v845_v41, %v846_v49  ;;  %v1556_v57 = vpack.c.bf16 %v346_v25, %v2081_v24 }
  0x8a   : > { %v1552_v55 = vpack.c.bf16 %v349_v48, %v342_v47  ;;  %1468 = vmatprep.mubr.f32.mxu0 %v321_v50  ;;  %v866_v58 = vand.u32 4294901760, %v865_v53  ;;  %v1580_v61 = vpack.c.bf16 %v863_v37, %v856_v29  ;;  %v1564_v62 = vpack.c.bf16 %v347_v32, %v340_v31 }
  0x8b   : > { %1510 = vmatprep.mubr.f32.mxu1 %v838_v51  ;;  %1469 = vmatmul.mubr.f32.vlgmr.msra.gmra.mrb[0].mxu0 %v331_v54  ;;  %v848_v59 = vand.u32 4294901760, %v847_v56  ;;  %v1588_v63 = vpack.c.bf16 %v864_v45, %v857_v36 }
  0x8c   : > { %1553 = vmatprep.subr.bf16.mxu0 %v1552_v55  ;;  %v1576_v60 = vpack.c.bf16 %v866_v58, %v859_v52  ;;  %1475 = vmatprep.mubr.f32.mxu0 %v2072_v19 }
  0x8d   : > { %1555 = vmatpush3.bf16.msra.mxu0 %v1552_v55  ;;  %1511 = vmatmul.mubr.f32.vlgmr.msra.gmra.mrb[0].mxu1 %v848_v59 }
  0x8e   : > { %1557 = vmatprep.subr.bf16.mxu0 %v1556_v57  ;;  %1577 = vmatprep.subr.bf16.mxu1 %v1576_v60 }
  0x8f   : > { %1517 = vmatprep.mubr.f32.mxu1 %v2074_v20  ;;  %1579 = vmatpush3.bf16.msra.mxu1 %v1576_v60 }
  0x90   : > { %1581 = vmatprep.subr.bf16.mxu1 %v1580_v61 }
  0x93   : > { %1476 = vmatmul.mubr.f32.vlgmr.msra.gmra.mrb[0].mxu0 %v2079_v23 }
  0x94   : > { %1559 = vmatpush3.bf16.msra.mxu0 %v1556_v57  ;;  %1482 = vmatprep.mubr.f32.mxu0 %v2085_v26 }
  0x95   : > { %1518 = vmatmul.mubr.f32.vlgmr.msra.gmra.mrb[0].mxu1 %v2097_v33  ;;  %1561 = vmatprep.subr.bf16.mxu0 %v2070_v18 }
  0x96   : > { %1583 = vmatpush3.bf16.msra.mxu1 %v1580_v61  ;;  %1524 = vmatprep.mubr.f32.mxu1 %v2088_v27 }
  0x97   : > { %1585 = vmatprep.subr.bf16.mxu1 %v2077_v22 }
  0x9b   : > { %1483 = vmatmul.mubr.f32.vlgmr.msra.gmra.mrb[0].mxu0 %v2094_v30 }
  0x9c   : > { %1563 = vmatpush3.bf16.msra.mxu0 %v2070_v18  ;;  %1489 = vmatprep.mubr.f32.mxu0 %v319_v34 }
  0x9d   : > { %1525 = vmatmul.mubr.f32.vlgmr.msra.gmra.mrb[0].mxu1 %v845_v41  ;;  %1565 = vmatprep.subr.bf16.mxu0 %v1564_v62 }
  0x9e   : > { %1587 = vmatpush3.bf16.msra.mxu1 %v2077_v22  ;;  %1531 = vmatprep.mubr.f32.mxu1 %v836_v35 }
  0x9f   : > { %1589 = vmatprep.subr.bf16.mxu1 %v1588_v63 }
  0xa3   : > { %1490 = vmatmul.mubr.f32.vlgmr.msra.gmra.mrb[0].mxu0 %v329_v38 }
  0xa4   : > { %1567 = vmatpush3.bf16.msra.mxu0 %v1564_v62  ;;  %1496 = vmatprep.mubr.f32.mxu0 %v2072_v19 }
  0xa5   : > { %1532 = vmatmul.mubr.f32.vlgmr.msra.gmra.mrb[0].mxu1 %v846_v49  ;;  %1569 = vmatprep.subr.bf16.mxu0 %v2070_v18 }
  0xa6   : > { %1591 = vmatpush3.bf16.msra.mxu1 %v1588_v63  ;;  %1538 = vmatprep.mubr.f32.mxu1 %v2074_v20 }
  0xa7   : > { %1593 = vmatprep.subr.bf16.mxu1 %v2077_v22 }
  0xab   : > { %1497 = vmatmul.mubr.f32.vlgmr.msra.gmra.mrb[0].mxu0 %v2079_v23 }
  0xac   : > { %1571 = vmatpush3.bf16.msra.mxu0 %v2070_v18  ;;  %1503 = vmatprep.mubr.f32.mxu0 %v2072_v19 }
  0xad   : > { %1539 = vmatmul.mubr.f32.vlgmr.msra.gmra.mrb[0].mxu1 %v2097_v33 }
  0xae   : > { %1595 = vmatpush3.bf16.msra.mxu1 %v2077_v22  ;;  %1545 = vmatprep.mubr.f32.mxu1 %v2074_v20 }
  0xb3   : > { %1504 = vmatmul.mubr.f32.vlgmr.msra.gmra.mrb[0].mxu0 %v2079_v23 }
  0xb5   : > { %1546 = vmatmul.mubr.f32.vlgmr.msra.gmra.mrb[0].mxu1 %v2097_v33 }
 0x186   : > { %v1505_v0 = vpop.f32.mrb[0].mxu0 }
 0x187   : > { %753 = vst [vmem:[#allocation2 + $0x8] sm:$0xff] %v1505_v0  ;;  %1404 = vst [vmem:[%s2059_s23 + $0x18] sm:$0xff] %v1505_v0  ;;  %v742_v1 = vpop.f32.mrb[1].mxu0 }
 0x188   : > { %v1547_v2 = vpop.f32.mrb[0].mxu1  ;;  %752 = vst [vmem:[#allocation2] sm:$0xff] %v742_v1  ;;  %1403 = vst [vmem:[%s2059_s23 + $0x10] sm:$0xff] %v742_v1 }
 0x189   : > { %1270 = vst [vmem:[#allocation3 + $0x8] sm:$0xff] %v1547_v2  ;;  %v1259_v3 = vpop.f32.mrb[1].mxu1 }
 0x18a   : > { %1269 = vst [vmem:[#allocation3] sm:$0xff] %v1259_v3 }
 0x18b PF: > { %p1405_p11 = scmp.ne.s32.totalorder %s1868_s15, 2 }
 0x18d   : > { %1274 = sbr.rel (%p1405_p11) target bundleno = 404 (0x194), region = 60 }
 0x18e   : > { %v1276_v5 = vld [vmem:[#allocation2 + $0x8] sm:$0xff] (!%p1405_p11) }
 0x18f   : > { %v1275_v4 = vld [vmem:[#allocation2] sm:$0xff] (!%p1405_p11)  ;;  %1407 = vst [vmem:[%s2059_s23 + $0x18] sm:$0xff] (!%p1405_p11), %v1276_v5 }
 0x190   : > { %1406 = vst [vmem:[%s2059_s23 + $0x10] sm:$0xff] (!%p1405_p11), %v1275_v4 }
 0x194 PF: > { %s1415_s26 = sshll.u32 %s1868_s15, 9  ;;  %s1296_s7 = sshll.u32 %s2059_s23, 4  ;;  %s2144_s7 = int_to_ptr.vmem [resolvable:$true] %s1296_s7 }
 0x195   : > { %s2141_s6 = scalar_lea.hbm %s2197_s3, %s1415_s26  ;;  %s2148_s8 = scalar_lea.sflag [#allocation6], %s211_s30 }
 0x196   : > { %s1790_s9 = scalar_lea.vmem %s2144_s7, 512  ;;  %p2212_p2 = scmp.ne.s32.totalorder %s2203_s22, 0 }
 0x197   : > { %p1791_p0 = scmp.ne.s32.totalorder %s2144_s7, %s1790_s9  ;;  %s1883_s15 = smov [#allocation10]  }
 0x198   : > { %s1794_s10 = sshll.u32 %s1883_s15, 4  ;;  %s1795_s10 = int_to_ptr.vmem [resolvable:$false] %s1794_s10 }
 0x199   : > { %p1792_p3 = pnand %p1791_p0, %p2212_p2  ;;  %s1796_s18 = scalar_lea.vmem %s1795_s10, 1024 }
 0x19a   : > { %p1797_p6 = scmp.lt.s32.totalorder %s2144_s7, %s1795_s10  ;;  %p1798_p7 = scmp.lt.s32.totalorder %s1796_s18, %s1790_s9 }
 0x19b   : > { %p1793_p5 = pneg %p1792_p3 }
 0x19c   : > { %p1799_p9 = por %p1798_p7, %p1797_p6 }
 0x19e   : > { %p1800_p12 = pnand %p1799_p9, %p1793_p5 }
 0x1a0   : > { %1803 = shalt.err (!%p1800_p12)
}
 0x1a1   : > { %s1804_s19 = scalar_lea.hbm %s2141_s6, 512  ;;  %s1808_s5 = scalar_lea.hbm %s2197_s3, 1536 }
 0x1a2   : > { %p1805_p4 = scmp.ne.s32.totalorder %s2141_s6, %s1804_s19  ;;  %p1809_p8 = scmp.lt.u32.totalorder %s2141_s6, %s2197_s3 }
 0x1a3   : > { %p1810_p10 = scmp.lt.u32.totalorder %s1808_s5, %s1804_s19  ;;  %p1812_p0 = scmp.lt.u32.totalorder %s1804_s19, %s2141_s6 }
 0x1a4   : > { %p1806_p1 = pnand %p1805_p4, %p2212_p2 }
 0x1a5   : > { %p1811_p11 = por %p1810_p10, %p1809_p8 }
 0x1a6   : > { %p1807_p13 = pneg %p1806_p1 }
 0x1a7   : > { %p1813_p3 = por %p1812_p0, %p1811_p11 }
 0x1a9   : > { %p1814_p5 = pnand %p1813_p3, %p1807_p13 }
 0x1ab   : > { %1817 = shalt.err (!%p1814_p5)
}
 0x1ac   : > { %s1884_s30 = smov 128   ;;  %s1885_s11 = smov 8  }
 0x1ad   : > { %1628 = dma.vmem_to_hbm [thread:$0]  (%p2212_p2), %s2144_s7, 512, %s2141_s6, %s2148_s8, %s1884_s30, %s1884_s30, %s1885_s11  }
 0x1ae PF: > { %p1650_p6 = scmp.ge.s32.totalorder %s1876_s17, 2  ;;  %s1311_s23 = sand.u32 1, %s1856_s12  }
 0x1af   : > { %p2213_p7 = scmp.ne.s32.totalorder %s2204_s24, 0  ;;  %s1312_s26 = scalar_lea.sflag [#allocation6], %s1311_s23 }
 0x1b1   : > { %p1641_p9 = pnand %p1650_p6, %p2213_p7 }
 0x1b3   : > { %1851 = dma.done.wait (!%p1641_p9), %s1312_s26, 512  }
 0x1b4   : > { %1853 = vsyncadd (!%p1641_p9), %s1312_s26, 4294966784  ;;  %s18_s17 = sadd.s32 1, %s1876_s17   ;;  %s2214_s12 = smov %s1860_s13 }
 0x1b5   : > { %p15_p12 = scmp.ge.s32.totalorder %s18_s17, 5   ;;  %s2215_s13 = smov %s1864_s14 }
 0x1b6   : > { %s2216_s14 = smov %s1959_s25  ;;  %s2217_s15 = smov %s1872_s16 }
 0x1b7   : > { %s2218_s16 = smov %s2220_s20  ;;  %17 = sbr.rel (!%p15_p12) target bundleno = 8 (0x8), region = 96 }
 0x1be   :  { %1317 = vsyncpa [#allocation5], 1 }
 0x1bf   :  { %1319 = vsyncpa [#allocation5 + $0x1], 1 }
 0x1c0   :  { %1320 = vsyncpa [#allocation8], 1 }
 0x1c1   :  { %1321 = vsyncpa [#allocation6], 1 }
 0x1c2   :  { %1323 = vsyncpa [#allocation6 + $0x1], 1 }

</bundles_post_ra>
